<compile_context>
chip_gen: v7x
topology: tpu7x:2x2x1
jax: 0.10.0
libtpu: 0.0.40
codegen_flags: <defaults>
</compile_context>

<pallas_src>
import jax
import jax.numpy as jnp
from jax.experimental import pallas as pl
from jax.experimental.pallas import tpu as pltpu


def _cbow_fused_kernel(x_ref, w1_ref, w2_ref, o_ref):
    # hidden = X_tile @ W1 -> kept entirely in vregs (one-vreg-ish intermediate),
    # fp32 accumulation on the MXU; no VMEM scratch store/load round-trip.
    h = jnp.dot(x_ref[...], w1_ref[...], preferred_element_type=jnp.float32)
    o_ref[...] = jnp.dot(
        h.astype(w2_ref.dtype), w2_ref[...], preferred_element_type=jnp.float32
    ).astype(o_ref.dtype)


def _cbow_vtiled_kernel(x_ref, w1_ref, w2_ref, o_ref, hid_ref):
    # V-column-tiled path: compute the hidden projection once per batch tile
    # (inner vcol axis j == 0) into a persistent VMEM scratch, then reuse it for
    # every W2 column block.
    @pl.when(pl.program_id(1) == 0)
    def _():
        hid_ref[...] = jnp.dot(
            x_ref[...], w1_ref[...], preferred_element_type=jnp.float32
        )

    o_ref[...] = jnp.dot(
        hid_ref[...].astype(w2_ref.dtype),
        w2_ref[...],
        preferred_element_type=jnp.float32,
    ).astype(o_ref.dtype)


def naive_cbow_forward(x, w1, w2, *, tm=None, tn=None, compute_dtype=None):
    """out = (x @ w1) @ w2  as a single Pallas TPU kernel.

    tm: batch tile (rows per grid step).  tn: output-column tile (None/V => no
    V tiling).  compute_dtype: e.g. jnp.bfloat16 for native MXU rate on
    v6e/v7x (accumulation stays fp32).
    """
    if compute_dtype is not None:
        x = x.astype(compute_dtype)
        w1 = w1.astype(compute_dtype)
        w2 = w2.astype(compute_dtype)

    B, V = x.shape
    Vw, D = w1.shape
    assert Vw == V and w2.shape == (D, V)

    # ---- tile selection (keep it simple & divisibility-safe for small shapes)
    if tm is None:
        tm = min(B, 256)
    tm = min(tm, B)
    if B % tm:
        tm = B  # small / ragged batch: single batch tile
    if tn is None:
        tn = V if V <= 2048 else 1024
    tn = min(tn, V)
    if V % tn:
        tn = V

    nb = B // tm
    nv = V // tn

    itemsize = jnp.dtype(x.dtype).itemsize
    cost = pl.CostEstimate(
        flops=4 * B * V * D,  # two matmuls: 2*B*V*D each
        transcendentals=0,
        bytes_accessed=(
            B * V * itemsize          # X
            + V * D * itemsize        # W1
            + D * V * itemsize        # W2
            + B * V * itemsize        # out
        ),
    )
    out_shape = jax.ShapeDtypeStruct((B, V), x.dtype)

    if nv == 1:
        # Fast path: W2 / output are narrow enough to keep whole in VMEM.
        grid_spec = pltpu.PrefetchScalarGridSpec(
            num_scalar_prefetch=0,
            grid=(nb,),
            in_specs=[
                pl.BlockSpec((tm, V), lambda i: (i, 0)),
                pl.BlockSpec((V, D), lambda i: (0, 0)),
                pl.BlockSpec((D, V), lambda i: (0, 0)),
            ],
            out_specs=pl.BlockSpec((tm, V), lambda i: (i, 0)),
        )
        kernel = _cbow_fused_kernel
        dim_sem = ("parallel",)
    else:
        # Large-vocab path: tile output columns, reuse hidden across them.
        grid_spec = pltpu.PrefetchScalarGridSpec(
            num_scalar_prefetch=0,
            grid=(nb, nv),
            in_specs=[
                pl.BlockSpec((tm, V), lambda i, j: (i, 0)),
                pl.BlockSpec((V, D), lambda i, j: (0, 0)),
                pl.BlockSpec((D, tn), lambda i, j: (0, j)),
            ],
            out_specs=pl.BlockSpec((tm, tn), lambda i, j: (i, j)),
            scratch_shapes=[pltpu.VMEM((tm, D), jnp.float32)],
        )
        kernel = _cbow_vtiled_kernel
        dim_sem = ("parallel", "arbitrary")

    return pl.pallas_call(
        kernel,
        out_shape=out_shape,
        grid_spec=grid_spec,
        compiler_params=pltpu.CompilerParams(dimension_semantics=dim_sem),
        cost_estimate=cost,
    )(x, w1, w2)


if __name__ == "__main__":
    # Shapes consistent with the module: VOCAB_SIZE=256, VECTOR_DIM=128.
    # Batch of 256 so the batch grid axis actually has >1 tile (tm=128).
    VOCAB_SIZE = 256
    VECTOR_DIM = 128
    BATCH = 256

    key = jax.random.PRNGKey(0)
    kx, kw1, kw2 = jax.random.split(key, 3)

    X = jax.random.normal(kx, (BATCH, VOCAB_SIZE), dtype=jnp.float32)
    W1 = jax.random.normal(kw1, (VOCAB_SIZE, VECTOR_DIM), dtype=jnp.float32)
    W2 = jax.random.normal(kw2, (VECTOR_DIM, VOCAB_SIZE), dtype=jnp.float32)

    ref = (X @ W1) @ W2

    # 1) fp32, batch-gridded (parallel across TensorCores), single V tile.
    out = naive_cbow_forward(X, W1, W2, tm=128)
    jax.block_until_ready(out)
    assert out.shape == (BATCH, VOCAB_SIZE)
    assert jnp.allclose(out, ref, rtol=1e-4, atol=1e-4)

    # 2) fp32, V-column-tiled path (hidden projection reused across col tiles).
    out_tiled = naive_cbow_forward(X, W1, W2, tm=128, tn=128)
    jax.block_until_ready(out_tiled)
    assert jnp.allclose(out_tiled, ref, rtol=1e-4, atol=1e-4)

    # 3) bf16 compute for native MXU rate on v6e/v7x (fp32 accumulation).
    out_bf16 = naive_cbow_forward(X, W1, W2, tm=128, compute_dtype=jnp.bfloat16)
    jax.block_until_ready(out_bf16)
    assert jnp.allclose(out_bf16.astype(jnp.float32), ref, rtol=5e-2, atol=8.0)

    print("KERNEL_OK")
</pallas_src>

<mosaic_0001>
module attributes {stable_mosaic.version = 11 : i64} {
  func.func @_cbow_fused_kernel(%arg0: i32, %arg1: memref<128x256xf32, #tpu.memory_space<vmem>>, %arg2: memref<256x128xf32, #tpu.memory_space<vmem>>, %arg3: memref<128x256xf32, #tpu.memory_space<vmem>>, %arg4: memref<128x256xf32, #tpu.memory_space<vmem>>) attributes {dimension_semantics = [#tpu.dimension_semantics<parallel>], iteration_bounds = array<i64: 2>, scalar_prefetch = 0 : i64, scratch_operands = 0 : i64, tpu.core_type = #tpu.core_type<tc>, window_params = [{transform_indices = @transform_0, window_bounds = array<i64: 128, 256>}, {pipeline_mode = #tpu.pipeline_mode<synchronous>, transform_indices = @transform_1, window_bounds = array<i64: 256, 128>}, {pipeline_mode = #tpu.pipeline_mode<synchronous>, transform_indices = @transform_2, window_bounds = array<i64: 128, 256>}, {transform_indices = @transform_3, window_bounds = array<i64: 128, 256>}]} {
    %c0 = arith.constant 0 : index
    %c0_0 = arith.constant 0 : index
    %0 = vector.load %arg1[%c0, %c0_0] : memref<128x256xf32, #tpu.memory_space<vmem>>, vector<128x256xf32>
    %c0_1 = arith.constant 0 : index
    %c0_2 = arith.constant 0 : index
    %1 = vector.load %arg2[%c0_1, %c0_2] : memref<256x128xf32, #tpu.memory_space<vmem>>, vector<256x128xf32>
    %cst = arith.constant dense<0.000000e+00> : vector<128x128xf32>
    %2 = tpu.matmul %0, %1, %cst {dimension_numbers = #tpu.dot_dimension_numbers<[1], [0], [0], [1], [0, 0, 1, 1], [], []>} : vector<128x256xf32>, vector<256x128xf32>, vector<128x128xf32> -> vector<128x128xf32>
    %c0_3 = arith.constant 0 : index
    %c0_4 = arith.constant 0 : index
    %3 = vector.load %arg3[%c0_3, %c0_4] : memref<128x256xf32, #tpu.memory_space<vmem>>, vector<128x256xf32>
    %cst_5 = arith.constant dense<0.000000e+00> : vector<128x256xf32>
    %4 = tpu.matmul %2, %3, %cst_5 {dimension_numbers = #tpu.dot_dimension_numbers<[1], [0], [0], [1], [0, 0, 1, 1], [], []>} : vector<128x128xf32>, vector<128x256xf32>, vector<128x256xf32> -> vector<128x256xf32>
    %c0_6 = arith.constant 0 : index
    %c0_7 = arith.constant 0 : index
    %5 = vector.load %arg4[%c0_6, %c0_7] : memref<128x256xf32, #tpu.memory_space<vmem>>, vector<128x256xf32>
    tpu.vector_store %arg4[%c0_6, %c0_7], %4 {strides = array<i32>} : memref<128x256xf32, #tpu.memory_space<vmem>>, vector<128x256xf32>,
    return
  }
  func.func @transform_0(%arg0: i32) -> (i32, i32) {
    %c0_i32 = arith.constant 0 : i32
    %c0_i32_0 = arith.constant 0 : i32
    return %arg0, %c0_i32 : i32, i32
  }
  func.func @transform_1(%arg0: i32) -> (i32, i32) {
    %c0_i32 = arith.constant 0 : i32
    %c0_i32_0 = arith.constant 0 : i32
    %c0_i32_1 = arith.constant 0 : i32
    return %c0_i32, %c0_i32_0 : i32, i32
  }
  func.func @transform_2(%arg0: i32) -> (i32, i32) {
    %c0_i32 = arith.constant 0 : i32
    %c0_i32_0 = arith.constant 0 : i32
    %c0_i32_1 = arith.constant 0 : i32
    return %c0_i32, %c0_i32_0 : i32, i32
  }
  func.func @transform_3(%arg0: i32) -> (i32, i32) {
    %c0_i32 = arith.constant 0 : i32
    %c0_i32_0 = arith.constant 0 : i32
    return %arg0, %c0_i32 : i32, i32
  }
}

</mosaic_0001>

<bundles_post_ra>
// kernel: tpu_custom_call.1
= control target key start
LH: loop header
LB: loop body
LE: loop exit
PB: predicated region body
PF: predicated region fallthrough
CT: control target
= control target key end

     0   :  { %8 = vsyncpa [#allocation3], 0  ;;  %s1522_s0 = inlined_call_operand.hbm [shape: f32[256,256], index: 0, kind: input, shape index: {}]   ;;  %s1523_s1 = inlined_call_operand.hbm [shape: f32[256,128], index: 1, kind: input, shape index: {}]   ;;  %s1524_s2 = inlined_call_operand.hbm [shape: f32[128,256], index: 2, kind: input, shape index: {}]   ;;  %s1525_s3 = inlined_call_operand.hbm [shape: f32[256,256], index: 3, kind: output, shape index: {}]  }
   0x1   :  { %10 = vsyncpa [#allocation3 + $0x1], 0 }
   0x2   :  { %11 = vsyncpa [#allocation6], 0 }
   0x3   :  { %12 = vsyncpa [#allocation4], 0 }
   0x4   :  { %14 = vsyncpa [#allocation4 + $0x1], 0  ;;  %s1193_s12 = smov 0   ;;  %s1195_s13 = smov 0  }
   0x5   :  { %s1197_s14 = smov 0   ;;  %s1199_s15 = smov 0  }
   0x6 LB: > { %s1214_s16 = sadd.s32 4294967295, %s1160_s15   ;;  %s762_s17 = sadd.s32 4294967294, %s1160_s15   ;;  %s1160_s15 = sphi %s1199_s15, %s1545_s15   ;;  %s1156_s14 = sphi %s1197_s14, %s1544_s14   ;;  %s1152_s13 = sphi %s1195_s13, %s1543_s13   ;;  %s1148_s12 = sphi %s1193_s12, %s1542_s12  }
   0x7   : > { %p40_p0 = scmp.ne.s32.totalorder %s1152_s13, %s1148_s12  ;;  %p1526_p1 = scmp.eq.s32.totalorder %s1214_s16, 0 }
   0x8   : > { %p112_p3 = scmp.eq.s32.totalorder %s762_s17, 1  ;;  %p763_p5 = scmp.ge.s32.totalorder %s1160_s15, 1 }
   0x9   : > { %p1223_p4 = por %p1526_p1, %p40_p0  ;;  %p119_p7 = scmp.lt.s32.totalorder %s1160_s15, 3 }
   0xa   : > { %p1228_p6 = por %p112_p3, %p40_p0  ;;  %s1162_s21 = smov [#allocation5]  }
   0xb   : > { %s1529_s18 = scalar_select %p1223_p4, 1, 0 }
   0xc   : > { %s1530_s19 = scalar_select %p1228_p6, 1, 0 }
   0xd   : > { %p1233_p8 = pnand %p763_p5, %p119_p7  ;;  %s131_s22 = sshll.u32 %s1162_s21, 4  ;;  %s1237_s22 = int_to_ptr.vmem [resolvable:$true] %s131_s22 }
   0xe   : > { %s1163_s24 = smov [#allocation7]   ;;  %s1004_s28 = scalar_lea.hbm %s1523_s1, 4096 }
   0xf   : > { %p942_p9 = pneg %p1233_p8  ;;  %s144_s25 = sshll.u32 %s1163_s24, 4  ;;  %s1248_s25 = int_to_ptr.vmem [resolvable:$true] %s144_s25 }
  0x10   : > { %p1005_p12 = scmp.ne.s32.totalorder %s1523_s1, %s1004_s28  ;;  %p1011_p5 = scmp.lt.u32.totalorder %s1004_s28, %s1523_s1 }
  0x11   : > { %p1244_p11 = pnand %p942_p9, %p1526_p1 }
  0x13   : > { %p1006_p13 = pneg %p1244_p11 }
  0x15   : > { %p1007_p0 = pnand %p1006_p13, %p1005_p12 }
  0x17   : > { %p1008_p3 = pneg %p1007_p0 }
  0x19   : > { %p1013_p7 = pnand %p1011_p5, %p1008_p3 }
  0x1b   : > { %1016 = shalt.err (!%p1013_p7)
}
  0x1c   : > { %s1017_s6 = scalar_lea.vmem %s1237_s22, 4096  ;;  %p1025_p2 = scmp.lt.s32.totalorder %s1237_s22, %s1237_s22 }
  0x1d   : > { %p1018_p9 = scmp.ne.s32.totalorder %s1237_s22, %s1017_s6  ;;  %p1026_p12 = scmp.lt.s32.totalorder %s1017_s6, %s1017_s6 }
  0x1f   : > { %p1020_p10 = pnand %p1018_p9, %p1006_p13  ;;  %p1027_p0 = por %p1026_p12, %p1025_p2 }
  0x21   : > { %p1021_p1 = pneg %p1020_p10 }
  0x23   : > { %p1028_p6 = pnand %p1027_p0, %p1021_p1 }
  0x25   : > { %1031 = shalt.err (!%p1028_p6)
}
  0x26   : > { %s1164_s7 = smov 128   ;;  %s1165_s8 = smov 8  }
  0x27   : > { %945 = dma.hbm_to_vmem [thread:$0]  (!%p1244_p11), %s1523_s1, 4096, %s1237_s22, [#allocation6], %s1164_s7, %s1164_s7, %s1165_s8  }
  0x28   : > { %s1032_s21 = scalar_lea.hbm %s1524_s2, 4096 }
  0x29   : > { %p1033_p2 = scmp.ne.s32.totalorder %s1524_s2, %s1032_s21  ;;  %p1039_p10 = scmp.lt.u32.totalorder %s1032_s21, %s1524_s2 }
  0x2b   : > { %p1035_p1 = pnand %p1033_p2, %p1006_p13 }
  0x2d   : > { %p1036_p6 = pneg %p1035_p1 }
  0x2f   : > { %p1041_p3 = pnand %p1039_p10, %p1036_p6 }
  0x31   : > { %1044 = shalt.err (!%p1041_p3)
}
  0x32   : > { %s1045_s22 = scalar_lea.vmem %s1248_s25, 4096  ;;  %p1053_p12 = scmp.lt.s32.totalorder %s1248_s25, %s1248_s25 }
  0x33   : > { %p1046_p5 = scmp.ne.s32.totalorder %s1248_s25, %s1045_s22  ;;  %p1054_p0 = scmp.lt.s32.totalorder %s1045_s22, %s1045_s22 }
  0x35   : > { %p1048_p7 = pnand %p1046_p5, %p1006_p13  ;;  %p1055_p2 = por %p1054_p0, %p1053_p12 }
  0x37   : > { %p1049_p9 = pneg %p1048_p7 }
  0x39   : > { %p1056_p1 = pnand %p1055_p2, %p1049_p9 }
  0x3b   : > { %1059 = shalt.err (!%p1056_p1)
}
  0x3c   : > { %s1166_s29 = smov 256   ;;  %s1167_s30 = smov 16  }
  0x3d   : > { %948 = dma.hbm_to_vmem [thread:$0]  (!%p1244_p11), %s1524_s2, 4096, %s1248_s25, [#allocation6], %s1166_s29, %s1166_s29, %s1167_s30  }
  0x3e   : > { %s1306_s6 = sadd.s32 1, %s1160_s15   ;;  %s27_s8 = sadd.s32 1, %s1156_s14 }
  0x3f   : > { %s24_s7 = ssub.s32 %s1160_s15, %s1306_s6  ;;  %p34_p6 = scmp.ne.s32.totalorder %s1156_s14, %s1152_s13 }
  0x40   : > { %p25_p13 = scmp.eq.s32.totalorder %s24_s7, 0  ;;  %p35_p10 = scmp.eq.s32.totalorder %s1160_s15, 0 }
  0x41   : > { %p1533_p5 = scmp.eq.s32.totalorder %s1214_s16, 1  ;;  %p959_p9 = scmp.lt.s32.totalorder %s1160_s15, 2 }
  0x42   : > { %s1315_s9 = scalar_select %p25_p13, %s1156_s14, %s27_s8  }
  0x43   : > { %p36_p3 = por %p35_p10, %p34_p6  ;;  %p1319_p7 = por %p1533_p5, %p34_p6 }
  0x44   : > { %s158_s10 = sand.u32 1, %s1156_s14   ;;  %s783_s25 = sshll.u32 %s1160_s15, 12 }
  0x45   : > { %s1534_s23 = scalar_select %p1319_p7, 1, 0 }
  0x46   : > { %s767_s11 = sshll.u32 %s158_s10, 8  ;;  %s1329_s24 = scalar_lea.hbm %s1522_s0, %s783_s25 }
  0x47   : > { %s162_s26 = scalar_lea.vmem [#allocation2], %s767_s11  ;;  %p1333_p11 = pnand %p959_p9, %p36_p3 }
  0x48   : > { %s170_s27 = sshll.u32 %s162_s26, 4  ;;  %s1337_s22 = scalar_lea.sflag [#allocation3], %s158_s10  ;;  %s1331_s27 = int_to_ptr.vmem [resolvable:$true] %s170_s27 }
  0x49   : > { %s1060_s4 = scalar_lea.hbm %s1329_s24, 4096  ;;  %p1062_p0 = pneg %p1333_p11 }
  0x4a   : > { %p1061_p12 = scmp.ne.s32.totalorder %s1329_s24, %s1060_s4  ;;  %s1065_s8 = scalar_lea.hbm %s1522_s0, 8192 }
  0x4b   : > { %p1066_p13 = scmp.lt.u32.totalorder %s1329_s24, %s1522_s0  ;;  %p1067_p6 = scmp.lt.u32.totalorder %s1065_s8, %s1060_s4 }
  0x4c   : > { %p1063_p2 = pnand %p1062_p0, %p1061_p12  ;;  %p1069_p3 = scmp.lt.u32.totalorder %s1060_s4, %s1329_s24 }
  0x4d   : > { %p1068_p10 = por %p1067_p6, %p1066_p13 }
  0x4e   : > { %p1064_p1 = pneg %p1063_p2 }
  0x4f   : > { %p1070_p5 = por %p1069_p3, %p1068_p10 }
  0x51   : > { %p1071_p9 = pnand %p1070_p5, %p1064_p1 }
  0x53   : > { %1074 = shalt.err (!%p1071_p9)
}
  0x54   : > { %s1075_s10 = scalar_lea.vmem %s1331_s27, 4096  ;;  %s1168_s17 = smov [#allocation2]  }
  0x55   : > { %p1076_p12 = scmp.ne.s32.totalorder %s1331_s27, %s1075_s10  ;;  %s1080_s21 = sshll.u32 %s1168_s17, 4  ;;  %s1081_s21 = int_to_ptr.vmem [resolvable:$false] %s1080_s21 }
  0x56   : > { %s1082_s26 = scalar_lea.vmem %s1081_s21, 8192  ;;  %p1083_p4 = scmp.lt.s32.totalorder %s1331_s27, %s1081_s21 }
  0x57   : > { %p1078_p2 = pnand %p1076_p12, %p1062_p0  ;;  %p1084_p13 = scmp.lt.s32.totalorder %s1082_s26, %s1075_s10 }
  0x59   : > { %p1079_p7 = pneg %p1078_p2  ;;  %p1085_p6 = por %p1084_p13, %p1083_p4 }
  0x5b   : > { %p1086_p10 = pnand %p1085_p6, %p1079_p7 }
  0x5d   : > { %1089 = shalt.err (!%p1086_p10)
}
  0x5e   : > { %952 = dma.hbm_to_vmem [thread:$0]  (!%p1333_p11), %s1329_s24, 4096, %s1331_s27, %s1337_s22, %s1166_s29, %s1166_s29, %s1167_s30  }
  0x5f   : > { %182 = sbr.rel (%p1233_p8) target bundleno = 644 (0x284), region = 32  ;;  %s1371_s4 = sand.u32 (!%p1233_p8), 1, %s1152_s13  }
  0x60   : > { %s772_s5 = sshll.u32 (!%p1233_p8), %s1371_s4, 8  ;;  %s185_s7 = scalar_lea.sflag (!%p1233_p8), [#allocation3], %s1371_s4 }
  0x61   : > { %s1377_s28 = scalar_lea.vmem (!%p1233_p8), [#allocation2], %s772_s5  ;;  %p1536_p4 = scmp.ne.s32.totalorder (!%p1233_p8), %s1529_s18, 0 }
  0x66   : > { %1135 = dma.done.wait (%p1536_p4), %s185_s7, 4096  }
  0x67   : > { %1137 = vsyncadd (%p1536_p4), %s185_s7, 4294963200  ;;  %p1537_p7 = scmp.eq.s32.totalorder %s1214_s16, 0 }
  0x69   : > { %1139 = dma.done.wait (%p1537_p7), [#allocation6], 8192   ;;  %p1538_p8 = pmov %p1537_p7 }
  0x6a   : > { %v269_v0 = vld [vmem:[#allocation5 + $0x80] sm:$0xff]  ;;  %v270_v1 = vld [vmem:[#allocation5 + $0x88] sm:$0xff]  ;;  %v271_v5 = vld [vmem:[#allocation5 + $0x90] sm:$0xff]  ;;  %s1437_s18 = scalar_lea.vmem [#allocation8], %s772_s5  ;;  %s785_s20 = sshll.u32 %s1214_s16, 12 }
  0x6b   : > { %1141 = vsyncadd (%p1538_p8), [#allocation6], 4294959104  ;;  %v253_v2 = vld [vmem:[#allocation5] sm:$0xff]  ;;  %v866_v3 = vpack.c.bf16 %v270_v1, %v269_v0  ;;  %v254_v4 = vld [vmem:[#allocation5 + $0x8] sm:$0xff]  ;;  %s670_s29 = sshll.u32 %s1437_s18, 4  ;;  %s1474_s27 = scalar_lea.hbm %s1525_s3, %s785_s20  ;;  %s1476_s29 = int_to_ptr.vmem [resolvable:$true] %s670_s29 }
  0x6c   : > { %v272_v6 = vld [vmem:[#allocation5 + $0x98] sm:$0xff]  ;;  %v868_v7 = vpack.c.bf16 %v254_v4, %v253_v2  ;;  %v255_v9 = vld [vmem:[#allocation5 + $0x10] sm:$0xff]  ;;  %v273_v11 = vld [vmem:[#allocation5 + $0xa0] sm:$0xff]  ;;  %s656_s22 = scalar_lea.sflag [#allocation4], %s1371_s4  ;;  %s1090_s16 = scalar_lea.vmem %s1476_s29, 4096 }
  0x6d   : > { %v870_v8 = vpack.c.bf16 %v272_v6, %v271_v5  ;;  %v256_v10 = vld [vmem:[#allocation5 + $0x18] sm:$0xff]  ;;  %867 = vmatprep.subr.bf16.mxu0 %v866_v3  ;;  %v274_v12 = vld [vmem:[#allocation5 + $0xa8] sm:$0xff]  ;;  %v257_v15 = vld [vmem:[#allocation5 + $0x20] sm:$0xff]  ;;  %p1091_p11 = scmp.ne.s32.totalorder %s1476_s29, %s1090_s16  ;;  %p1539_p0 = scmp.ne.s32.totalorder %s1534_s23, 0 }
  0x6e   : > { %869 = vmatpush3.bf16.msra.mxu0 %v868_v7  ;;  %v872_v13 = vpack.c.bf16 %v256_v10, %v255_v9  ;;  %v874_v14 = vpack.c.bf16 %v274_v12, %v273_v11  ;;  %v258_v16 = vld [vmem:[#allocation5 + $0x28] sm:$0xff]  ;;  %v275_v17 = vld [vmem:[#allocation5 + $0xb0] sm:$0xff]  ;;  %v276_v18 = vld [vmem:[#allocation5 + $0xb8] sm:$0xff]  ;;  %s1170_s8 = smov [#allocation8]  }
  0x6f   : > { %871 = vmatprep.subr.bf16.mxu0 %v870_v8  ;;  %v876_v19 = vpack.c.bf16 %v258_v16, %v257_v15  ;;  %v878_v20 = vpack.c.bf16 %v276_v18, %v275_v17  ;;  %v259_v21 = vld [vmem:[#allocation5 + $0x30] sm:$0xff]  ;;  %v260_v22 = vld [vmem:[#allocation5 + $0x38] sm:$0xff]  ;;  %v277_v23 = vld [vmem:[#allocation5 + $0xc0] sm:$0xff]  ;;  %p1092_p1 = pnand %p1091_p11, %p1539_p0  ;;  %s1094_s11 = sshll.u32 %s1170_s8, 4  ;;  %s1095_s11 = int_to_ptr.vmem [resolvable:$false] %s1094_s11 }
  0x70   : > { %v278_v24 = vld [vmem:[#allocation5 + $0xc8] sm:$0xff]  ;;  %v880_v26 = vpack.c.bf16 %v260_v22, %v259_v21  ;;  %v261_v28 = vld [vmem:[#allocation5 + $0x40] sm:$0xff]  ;;  %v279_v30 = vld [vmem:[#allocation5 + $0xd0] sm:$0xff]  ;;  %s1096_s25 = scalar_lea.vmem %s1095_s11, 8192  ;;  %p1097_p5 = scmp.lt.s32.totalorder %s1476_s29, %s1095_s11 }
  0x71   : > { %v222_v25 = vld [vmem:[%s1377_s28 + $0x8] sm:$0xff]  ;;  %v882_v27 = vpack.c.bf16 %v278_v24, %v277_v23  ;;  %v280_v31 = vld [vmem:[#allocation5 + $0xd8] sm:$0xff]  ;;  %v263_v34 = vld [vmem:[#allocation5 + $0x50] sm:$0xff]  ;;  %p1093_p3 = pneg %p1092_p1  ;;  %p1098_p9 = scmp.lt.s32.totalorder %s1096_s25, %s1090_s16 }
  0x72   : > { %873 = vmatpush3.bf16.msra.mxu0 %v872_v13  ;;  %349 = vmatprep.mubr.f32.mxu0 %v222_v25  ;;  %v262_v29 = vld [vmem:[#allocation5 + $0x48] sm:$0xff]  ;;  %v886_v33 = vpack.c.bf16 %v280_v31, %v279_v30  ;;  %v264_v35 = vld [vmem:[#allocation5 + $0x58] sm:$0xff]  ;;  %v281_v36 = vld [vmem:[#allocation5 + $0xe0] sm:$0xff] }
  0x73   : > { %875 = vmatprep.subr.bf16.mxu0 %v874_v14  ;;  %v884_v32 = vpack.c.bf16 %v262_v29, %v261_v28  ;;  %v282_v37 = vld [vmem:[#allocation5 + $0xe8] sm:$0xff]  ;;  %v888_v38 = vpack.c.bf16 %v264_v35, %v263_v34  ;;  %v265_v39 = vld [vmem:[#allocation5 + $0x60] sm:$0xff]  ;;  %v283_v41 = vld [vmem:[#allocation5 + $0xf0] sm:$0xff]  ;;  %p1099_p12 = por %p1098_p9, %p1097_p5 }
  0x74   : > { %v266_v40 = vld [vmem:[#allocation5 + $0x68] sm:$0xff]  ;;  %v890_v42 = vpack.c.bf16 %v282_v37, %v281_v36  ;;  %v284_v43 = vld [vmem:[#allocation5 + $0xf8] sm:$0xff]  ;;  %v430_v47 = vld [vmem:[#allocation7] sm:$0xff] }
  0x75   : > { %v431_v44 = vld [vmem:[#allocation7 + $0x8] sm:$0xff]  ;;  %v433_v45 = vld [vmem:[#allocation7 + $0x18] sm:$0xff]  ;;  %v432_v48 = vld [vmem:[#allocation7 + $0x10] sm:$0xff]  ;;  %v892_v54 = vpack.c.bf16 %v266_v40, %v265_v39  ;;  %v894_v58 = vpack.c.bf16 %v284_v43, %v283_v41  ;;  %p1100_p2 = pnand %p1099_p12, %p1093_p3 }
  0x76   : > { %877 = vmatpush3.bf16.msra.mxu0 %v876_v19  ;;  %v898_v46 = vpack.c.bf16 %v433_v45, %v431_v44  ;;  %v435_v49 = vld [vmem:[#allocation7 + $0x28] sm:$0xff]  ;;  %v900_v50 = vpack.c.bf16 %v432_v48, %v430_v47  ;;  %v437_v51 = vld [vmem:[#allocation7 + $0x38] sm:$0xff]  ;;  %v434_v52 = vld [vmem:[#allocation7 + $0x20] sm:$0xff] }
  0x77   : > { %879 = vmatprep.subr.bf16.mxu0 %v878_v20  ;;  %v436_v53 = vld [vmem:[#allocation7 + $0x30] sm:$0xff]  ;;  %v902_v55 = vpack.c.bf16 %v437_v51, %v435_v49  ;;  %v439_v56 = vld [vmem:[#allocation7 + $0x48] sm:$0xff]  ;;  %v441_v57 = vld [vmem:[#allocation7 + $0x58] sm:$0xff] }
  0x78   : > { %899 = vmatprep.subr.bf16.mxu1 %v898_v46  ;;  %v267_v59 = vld [vmem:[#allocation5 + $0x70] sm:$0xff]  ;;  %v268_v60 = vld [vmem:[#allocation5 + $0x78] sm:$0xff]  ;;  %v904_v61 = vpack.c.bf16 %v436_v53, %v434_v52  ;;  %v906_v62 = vpack.c.bf16 %v441_v57, %v439_v56  ;;  %v438_v63 = vld [vmem:[#allocation7 + $0x40] sm:$0xff] }
  0x79   : > { %901 = vmatpush1.bf16.msra.mxu1 %v900_v50  ;;  %v440_v0 = vld [vmem:[#allocation7 + $0x50] sm:$0xff]  ;;  %v443_v1 = vld [vmem:[#allocation7 + $0x68] sm:$0xff]  ;;  %v445_v2 = vld [vmem:[#allocation7 + $0x78] sm:$0xff]  ;;  %v896_v3 = vpack.c.bf16 %v268_v60, %v267_v59 }
  0x7a   : > { %881 = vmatpush3.bf16.msra.mxu0 %v880_v26  ;;  %903 = vmatprep.subr.bf16.mxu1 %v902_v55  ;;  %v908_v4 = vpack.c.bf16 %v440_v0, %v438_v63  ;;  %v910_v5 = vpack.c.bf16 %v445_v2, %v443_v1  ;;  %v442_v6 = vld [vmem:[#allocation7 + $0x60] sm:$0xff]  ;;  %v444_v7 = vld [vmem:[#allocation7 + $0x70] sm:$0xff]  ;;  %v447_v8 = vld [vmem:[#allocation7 + $0x88] sm:$0xff]  ;;  %v1169_v0 = vmov 0.0  }
  0x7b   : > { %883 = vmatprep.subr.bf16.mxu0 %v882_v27  ;;  %v449_v9 = vld [vmem:[#allocation7 + $0x98] sm:$0xff]  ;;  %v221_v10 = vld [vmem:[%s1377_s28] sm:$0xff]  ;;  %v912_v12 = vpack.c.bf16 %v444_v7, %v442_v6  ;;  %v448_v15 = vld [vmem:[#allocation7 + $0x90] sm:$0xff]  ;;  %526 = vmatprep.mubr.f32.mxu1 %v1169_v0 }
  0x7c   : > { %v224_v11 = vld [vmem:[%s1377_s28 + $0x18] sm:$0xff]  ;;  %v914_v13 = vpack.c.bf16 %v449_v9, %v447_v8  ;;  %v446_v14 = vld [vmem:[#allocation7 + $0x80] sm:$0xff]  ;;  %v451_v16 = vld [vmem:[#allocation7 + $0xa8] sm:$0xff] }
  0x7d   : > { %905 = vmatpush1.bf16.msra.mxu1 %v904_v61  ;;  %v453_v17 = vld [vmem:[#allocation7 + $0xb8] sm:$0xff]  ;;  %v223_v18 = vld [vmem:[%s1377_s28 + $0x10] sm:$0xff]  ;;  %v226_v19 = vld [vmem:[%s1377_s28 + $0x28] sm:$0xff]  ;;  %v916_v20 = vpack.c.bf16 %v448_v15, %v446_v14 }
  0x7e   : > { %885 = vmatpush3.bf16.msra.mxu0 %v884_v32  ;;  %907 = vmatprep.subr.bf16.mxu1 %v906_v62  ;;  %v918_v21 = vpack.c.bf16 %v453_v17, %v451_v16  ;;  %v450_v22 = vld [vmem:[#allocation7 + $0xa0] sm:$0xff]  ;;  %v452_v23 = vld [vmem:[#allocation7 + $0xb0] sm:$0xff]  ;;  %v455_v24 = vld [vmem:[#allocation7 + $0xc8] sm:$0xff] }
  0x7f   : > { %887 = vmatprep.subr.bf16.mxu0 %v886_v33  ;;  %v457_v25 = vld [vmem:[#allocation7 + $0xd8] sm:$0xff]  ;;  %v225_v26 = vld [vmem:[%s1377_s28 + $0x20] sm:$0xff]  ;;  %v920_v28 = vpack.c.bf16 %v452_v23, %v450_v22  ;;  %v456_v31 = vld [vmem:[#allocation7 + $0xd0] sm:$0xff] }
  0x80   : > { %v228_v27 = vld [vmem:[%s1377_s28 + $0x38] sm:$0xff]  ;;  %v922_v29 = vpack.c.bf16 %v457_v25, %v455_v24  ;;  %v454_v30 = vld [vmem:[#allocation7 + $0xc0] sm:$0xff]  ;;  %v227_v32 = vld [vmem:[%s1377_s28 + $0x30] sm:$0xff] }
  0x81   : > { %909 = vmatpush1.bf16.msra.mxu1 %v908_v4  ;;  %v230_v33 = vld [vmem:[%s1377_s28 + $0x48] sm:$0xff]  ;;  %v924_v34 = vpack.c.bf16 %v456_v31, %v454_v30  ;;  %v229_v35 = vld [vmem:[%s1377_s28 + $0x40] sm:$0xff]  ;;  %v232_v36 = vld [vmem:[%s1377_s28 + $0x58] sm:$0xff] }
  0x82   : > { %889 = vmatpush3.bf16.msra.mxu0 %v888_v38  ;;  %911 = vmatprep.subr.bf16.mxu1 %v910_v5  ;;  %v231_v37 = vld [vmem:[%s1377_s28 + $0x50] sm:$0xff]  ;;  %v234_v38 = vld [vmem:[%s1377_s28 + $0x68] sm:$0xff]  ;;  %v233_v39 = vld [vmem:[%s1377_s28 + $0x60] sm:$0xff] }
  0x83   : > { %891 = vmatprep.subr.bf16.mxu0 %v890_v42  ;;  %v236_v40 = vld [vmem:[%s1377_s28 + $0x78] sm:$0xff]  ;;  %v235_v41 = vld [vmem:[%s1377_s28 + $0x70] sm:$0xff]  ;;  %v238_v42 = vld [vmem:[%s1377_s28 + $0x88] sm:$0xff] }
  0x84   : > { %v237_v43 = vld [vmem:[%s1377_s28 + $0x80] sm:$0xff]  ;;  %v240_v44 = vld [vmem:[%s1377_s28 + $0x98] sm:$0xff]  ;;  %v239_v45 = vld [vmem:[%s1377_s28 + $0x90] sm:$0xff] }
  0x85   : > { %913 = vmatpush1.bf16.msra.mxu1 %v912_v12  ;;  %v242_v46 = vld [vmem:[%s1377_s28 + $0xa8] sm:$0xff]  ;;  %v241_v47 = vld [vmem:[%s1377_s28 + $0xa0] sm:$0xff]  ;;  %v244_v48 = vld [vmem:[%s1377_s28 + $0xb8] sm:$0xff] }
  0x86   : > { %893 = vmatpush3.bf16.msra.mxu0 %v892_v54  ;;  %915 = vmatprep.subr.bf16.mxu1 %v914_v13  ;;  %v243_v49 = vld [vmem:[%s1377_s28 + $0xb0] sm:$0xff]  ;;  %v246_v50 = vld [vmem:[%s1377_s28 + $0xc8] sm:$0xff]  ;;  %v245_v51 = vld [vmem:[%s1377_s28 + $0xc0] sm:$0xff] }
  0x87   : > { %895 = vmatprep.subr.bf16.mxu0 %v894_v58  ;;  %v248_v52 = vld [vmem:[%s1377_s28 + $0xd8] sm:$0xff]  ;;  %v247_v53 = vld [vmem:[%s1377_s28 + $0xd0] sm:$0xff]  ;;  %v250_v54 = vld [vmem:[%s1377_s28 + $0xe8] sm:$0xff] }
  0x88   : > { %v249_v55 = vld [vmem:[%s1377_s28 + $0xe0] sm:$0xff]  ;;  %v252_v56 = vld [vmem:[%s1377_s28 + $0xf8] sm:$0xff]  ;;  %v251_v57 = vld [vmem:[%s1377_s28 + $0xf0] sm:$0xff] }
  0x89   : > { %917 = vmatpush1.bf16.msra.mxu1 %v916_v20  ;;  %v459_v58 = vld [vmem:[#allocation7 + $0xe8] sm:$0xff]  ;;  %v461_v59 = vld [vmem:[#allocation7 + $0xf8] sm:$0xff]  ;;  %v458_v61 = vld [vmem:[#allocation7 + $0xe0] sm:$0xff] }
  0x8a   : > { %897 = vmatpush3.bf16.msra.mxu0 %v896_v3  ;;  %919 = vmatprep.subr.bf16.mxu1 %v918_v21  ;;  %v926_v60 = vpack.c.bf16 %v461_v59, %v459_v58  ;;  %v460_v62 = vld [vmem:[#allocation7 + $0xf0] sm:$0xff] }
  0x8b   : > { %v928_v63 = vpack.c.bf16 %v460_v62, %v458_v61 }
  0x8d   : > { %350 = vmatmul.mubr.f32.vlgmr.msra.gmra.mrb[0].mxu0 %v221_v10  ;;  %921 = vmatpush1.bf16.msra.mxu1 %v920_v28 }
  0x8e   : > { %354 = vmatprep.mubr.f32.mxu0 %v224_v11  ;;  %923 = vmatprep.subr.bf16.mxu1 %v922_v29 }
  0x91   : > { %355 = vmatmul.mubr.f32.gmra.mrb[2].mxu0 %v223_v18  ;;  %925 = vmatpush1.bf16.msra.mxu1 %v924_v34 }
  0x92   : > { %359 = vmatprep.mubr.f32.mxu0 %v226_v19  ;;  %927 = vmatprep.subr.bf16.mxu1 %v926_v60 }
  0x95   : > { %360 = vmatmul.mubr.f32.gmra.mrb[4].mxu0 %v225_v26  ;;  %929 = vmatpush1.bf16.msra.mxu1 %v928_v63 }
  0x96   : > { %364 = vmatprep.mubr.f32.mxu0 %v228_v27 }
  0x99   : > { %365 = vmatmul.mubr.f32.gmra.mrb[6].mxu0 %v227_v32 }
  0x9a   : > { %369 = vmatprep.mubr.f32.mxu0 %v230_v33 }
  0x9d   : > { %370 = vmatmul.mubr.f32.gmra.mrb[8].mxu0 %v229_v35 }
  0x9e   : > { %374 = vmatprep.mubr.f32.mxu0 %v232_v36 }
  0xa1   : > { %375 = vmatmul.mubr.f32.gmra.mrb[10].mxu0 %v231_v37 }
  0xa2   : > { %379 = vmatprep.mubr.f32.mxu0 %v234_v38 }
  0xa5   : > { %380 = vmatmul.mubr.f32.gmra.mrb[12].mxu0 %v233_v39 }
  0xa6   : > { %384 = vmatprep.mubr.f32.mxu0 %v236_v40 }
  0xa9   : > { %385 = vmatmul.mubr.f32.gmra.mrb[14].mxu0 %v235_v41 }
  0xaa   : > { %389 = vmatprep.mubr.f32.mxu0 %v238_v42 }
  0xad   : > { %390 = vmatmul.mubr.f32.gmra.mrb[16].mxu0 %v237_v43 }
  0xae   : > { %394 = vmatprep.mubr.f32.mxu0 %v240_v44 }
  0xb1   : > { %395 = vmatmul.mubr.f32.gmra.mrb[18].mxu0 %v239_v45 }
  0xb2   : > { %399 = vmatprep.mubr.f32.mxu0 %v242_v46 }
  0xb5   : > { %400 = vmatmul.mubr.f32.gmra.mrb[20].mxu0 %v241_v47 }
  0xb6   : > { %404 = vmatprep.mubr.f32.mxu0 %v244_v48 }
  0xb9   : > { %405 = vmatmul.mubr.f32.gmra.mrb[22].mxu0 %v243_v49 }
  0xba   : > { %409 = vmatprep.mubr.f32.mxu0 %v246_v50 }
  0xbd   : > { %410 = vmatmul.mubr.f32.gmra.mrb[24].mxu0 %v245_v51 }
  0xbe   : > { %414 = vmatprep.mubr.f32.mxu0 %v248_v52 }
  0xc1   : > { %415 = vmatmul.mubr.f32.gmra.mrb[26].mxu0 %v247_v53 }
  0xc2   : > { %419 = vmatprep.mubr.f32.mxu0 %v250_v54 }
  0xc5   : > { %420 = vmatmul.mubr.f32.gmra.mrb[28].mxu0 %v249_v55 }
  0xc6   : > { %424 = vmatprep.mubr.f32.mxu0 %v252_v56 }
  0xc9   : > { %425 = vmatmul.mubr.f32.gmra.mrb[30].mxu0 %v251_v57 }
 0x160   : > { %v818_v1 = vpop.f32.mrb[0].mxu0 }
 0x161   : > { %v819_v2 = vpop.f32.mrb[1].mxu0 }
 0x162   : > { %v820_v3 = vadd.f32 %v819_v2, %v818_v1 }
 0x164   : > { %v821_v4 = vpop.f32.mrb[2].mxu0  ;;  %527 = vmatmul.mubr.f32.vlgmr.msra.gmra.mrb[0].mxu1 %v820_v3 }
 0x165   : > { %v822_v5 = vpop.f32.mrb[3].mxu0  ;;  %532 = vmatprep.mubr.f32.mxu1 %v1169_v0 }
 0x166   : > { %v823_v6 = vadd.f32 %v822_v5, %v821_v4 }
 0x168   : > { %v824_v7 = vpop.f32.mrb[4].mxu0  ;;  %533 = vmatmul.mubr.f32.gmra.mrb[2].mxu1 %v823_v6 }
 0x169   : > { %v825_v8 = vpop.f32.mrb[5].mxu0  ;;  %538 = vmatprep.mubr.f32.mxu1 %v1169_v0 }
 0x16a   : > { %v826_v9 = vadd.f32 %v825_v8, %v824_v7 }
 0x16c   : > { %v827_v10 = vpop.f32.mrb[6].mxu0  ;;  %539 = vmatmul.mubr.f32.gmra.mrb[4].mxu1 %v826_v9 }
 0x16d   : > { %v828_v11 = vpop.f32.mrb[7].mxu0  ;;  %544 = vmatprep.mubr.f32.mxu1 %v1169_v0 }
 0x16e   : > { %v829_v12 = vadd.f32 %v828_v11, %v827_v10 }
 0x170   : > { %v830_v13 = vpop.f32.mrb[8].mxu0  ;;  %545 = vmatmul.mubr.f32.gmra.mrb[6].mxu1 %v829_v12 }
 0x171   : > { %v831_v14 = vpop.f32.mrb[9].mxu0  ;;  %550 = vmatprep.mubr.f32.mxu1 %v1169_v0 }
 0x172   : > { %v832_v15 = vadd.f32 %v831_v14, %v830_v13 }
 0x174   : > { %v833_v16 = vpop.f32.mrb[10].mxu0  ;;  %551 = vmatmul.mubr.f32.gmra.mrb[8].mxu1 %v832_v15 }
 0x175   : > { %v834_v17 = vpop.f32.mrb[11].mxu0  ;;  %556 = vmatprep.mubr.f32.mxu1 %v1169_v0 }
 0x176   : > { %v835_v18 = vadd.f32 %v834_v17, %v833_v16 }
 0x178   : > { %v836_v19 = vpop.f32.mrb[12].mxu0  ;;  %557 = vmatmul.mubr.f32.gmra.mrb[10].mxu1 %v835_v18 }
 0x179   : > { %v837_v20 = vpop.f32.mrb[13].mxu0  ;;  %562 = vmatprep.mubr.f32.mxu1 %v1169_v0 }
 0x17a   : > { %v838_v21 = vadd.f32 %v837_v20, %v836_v19 }
 0x17c   : > { %v839_v22 = vpop.f32.mrb[14].mxu0  ;;  %563 = vmatmul.mubr.f32.gmra.mrb[12].mxu1 %v838_v21 }
 0x17d   : > { %v840_v23 = vpop.f32.mrb[15].mxu0  ;;  %568 = vmatprep.mubr.f32.mxu1 %v1169_v0 }
 0x17e   : > { %v841_v24 = vadd.f32 %v840_v23, %v839_v22 }
 0x180   : > { %v842_v25 = vpop.f32.mrb[16].mxu0  ;;  %569 = vmatmul.mubr.f32.gmra.mrb[14].mxu1 %v841_v24 }
 0x181   : > { %v843_v26 = vpop.f32.mrb[17].mxu0  ;;  %574 = vmatprep.mubr.f32.mxu1 %v1169_v0 }
 0x182   : > { %v844_v27 = vadd.f32 %v843_v26, %v842_v25 }
 0x184   : > { %v845_v28 = vpop.f32.mrb[18].mxu0  ;;  %575 = vmatmul.mubr.f32.gmra.mrb[16].mxu1 %v844_v27 }
 0x185   : > { %v846_v29 = vpop.f32.mrb[19].mxu0  ;;  %580 = vmatprep.mubr.f32.mxu1 %v1169_v0 }
 0x186   : > { %v847_v30 = vadd.f32 %v846_v29, %v845_v28 }
 0x188   : > { %v848_v31 = vpop.f32.mrb[20].mxu0  ;;  %581 = vmatmul.mubr.f32.gmra.mrb[18].mxu1 %v847_v30 }
 0x189   : > { %v849_v32 = vpop.f32.mrb[21].mxu0  ;;  %586 = vmatprep.mubr.f32.mxu1 %v1169_v0 }
 0x18a   : > { %v850_v33 = vadd.f32 %v849_v32, %v848_v31 }
 0x18c   : > { %v851_v34 = vpop.f32.mrb[22].mxu0  ;;  %587 = vmatmul.mubr.f32.gmra.mrb[20].mxu1 %v850_v33 }
 0x18d   : > { %v852_v35 = vpop.f32.mrb[23].mxu0  ;;  %592 = vmatprep.mubr.f32.mxu1 %v1169_v0 }
 0x18e   : > { %v853_v36 = vadd.f32 %v852_v35, %v851_v34 }
 0x190   : > { %v854_v37 = vpop.f32.mrb[24].mxu0  ;;  %593 = vmatmul.mubr.f32.gmra.mrb[22].mxu1 %v853_v36 }
 0x191   : > { %v855_v38 = vpop.f32.mrb[25].mxu0  ;;  %598 = vmatprep.mubr.f32.mxu1 %v1169_v0 }
 0x192   : > { %v856_v39 = vadd.f32 %v855_v38, %v854_v37 }
 0x194   : > { %v857_v40 = vpop.f32.mrb[26].mxu0  ;;  %599 = vmatmul.mubr.f32.gmra.mrb[24].mxu1 %v856_v39 }
 0x195   : > { %v858_v41 = vpop.f32.mrb[27].mxu0  ;;  %604 = vmatprep.mubr.f32.mxu1 %v1169_v0 }
 0x196   : > { %v859_v42 = vadd.f32 %v858_v41, %v857_v40 }
 0x198   : > { %v860_v43 = vpop.f32.mrb[28].mxu0  ;;  %605 = vmatmul.mubr.f32.gmra.mrb[26].mxu1 %v859_v42 }
 0x199   : > { %v861_v44 = vpop.f32.mrb[29].mxu0  ;;  %610 = vmatprep.mubr.f32.mxu1 %v1169_v0 }
 0x19a   : > { %v862_v45 = vadd.f32 %v861_v44, %v860_v43 }
 0x19c   : > { %v863_v46 = vpop.f32.mrb[30].mxu0  ;;  %611 = vmatmul.mubr.f32.gmra.mrb[28].mxu1 %v862_v45 }
 0x19d   : > { %v864_v47 = vpop.f32.mrb[31].mxu0  ;;  %616 = vmatprep.mubr.f32.mxu1 %v1169_v0 }
 0x19e   : > { %v865_v48 = vadd.f32 %v864_v47, %v863_v46 }
 0x1a0   : > { %617 = vmatmul.mubr.f32.gmra.mrb[30].mxu1 %v865_v48 }
 0x237   : > { %v528_v49 = vpop.f32.mrb[0].mxu1 }
 0x238   : > { %623 = vst [vmem:[%s1437_s18] sm:$0xff] %v528_v49  ;;  %v530_v50 = vpop.f32.mrb[1].mxu1 }
 0x239   : > { %624 = vst [vmem:[%s1437_s18 + $0x8] sm:$0xff] %v530_v50 }
 0x23b   : > { %v534_v51 = vpop.f32.mrb[2].mxu1 }
 0x23c   : > { %625 = vst [vmem:[%s1437_s18 + $0x10] sm:$0xff] %v534_v51  ;;  %v536_v52 = vpop.f32.mrb[3].mxu1 }
 0x23d   : > { %626 = vst [vmem:[%s1437_s18 + $0x18] sm:$0xff] %v536_v52 }
 0x23f   : > { %v540_v53 = vpop.f32.mrb[4].mxu1 }
 0x240   : > { %627 = vst [vmem:[%s1437_s18 + $0x20] sm:$0xff] %v540_v53  ;;  %v542_v54 = vpop.f32.mrb[5].mxu1 }
 0x241   : > { %628 = vst [vmem:[%s1437_s18 + $0x28] sm:$0xff] %v542_v54 }
 0x243   : > { %v546_v55 = vpop.f32.mrb[6].mxu1 }
 0x244   : > { %629 = vst [vmem:[%s1437_s18 + $0x30] sm:$0xff] %v546_v55  ;;  %v548_v56 = vpop.f32.mrb[7].mxu1 }
 0x245   : > { %630 = vst [vmem:[%s1437_s18 + $0x38] sm:$0xff] %v548_v56 }
 0x247   : > { %v552_v57 = vpop.f32.mrb[8].mxu1 }
 0x248   : > { %631 = vst [vmem:[%s1437_s18 + $0x40] sm:$0xff] %v552_v57  ;;  %v554_v58 = vpop.f32.mrb[9].mxu1 }
 0x249   : > { %632 = vst [vmem:[%s1437_s18 + $0x48] sm:$0xff] %v554_v58 }
 0x24b   : > { %v558_v59 = vpop.f32.mrb[10].mxu1 }
 0x24c   : > { %633 = vst [vmem:[%s1437_s18 + $0x50] sm:$0xff] %v558_v59  ;;  %v560_v60 = vpop.f32.mrb[11].mxu1 }
 0x24d   : > { %634 = vst [vmem:[%s1437_s18 + $0x58] sm:$0xff] %v560_v60 }
 0x24f   : > { %v564_v61 = vpop.f32.mrb[12].mxu1 }
 0x250   : > { %635 = vst [vmem:[%s1437_s18 + $0x60] sm:$0xff] %v564_v61  ;;  %v566_v62 = vpop.f32.mrb[13].mxu1 }
 0x251   : > { %636 = vst [vmem:[%s1437_s18 + $0x68] sm:$0xff] %v566_v62 }
 0x253   : > { %v570_v63 = vpop.f32.mrb[14].mxu1 }
 0x254   : > { %637 = vst [vmem:[%s1437_s18 + $0x70] sm:$0xff] %v570_v63  ;;  %v572_v0 = vpop.f32.mrb[15].mxu1 }
 0x255   : > { %638 = vst [vmem:[%s1437_s18 + $0x78] sm:$0xff] %v572_v0 }
 0x257   : > { %v576_v1 = vpop.f32.mrb[16].mxu1 }
 0x258   : > { %639 = vst [vmem:[%s1437_s18 + $0x80] sm:$0xff] %v576_v1  ;;  %v578_v2 = vpop.f32.mrb[17].mxu1 }
 0x259   : > { %640 = vst [vmem:[%s1437_s18 + $0x88] sm:$0xff] %v578_v2 }
 0x25b   : > { %v582_v3 = vpop.f32.mrb[18].mxu1 }
 0x25c   : > { %641 = vst [vmem:[%s1437_s18 + $0x90] sm:$0xff] %v582_v3  ;;  %v584_v4 = vpop.f32.mrb[19].mxu1 }
 0x25d   : > { %642 = vst [vmem:[%s1437_s18 + $0x98] sm:$0xff] %v584_v4 }
 0x25f   : > { %v588_v5 = vpop.f32.mrb[20].mxu1 }
 0x260   : > { %643 = vst [vmem:[%s1437_s18 + $0xa0] sm:$0xff] %v588_v5  ;;  %v590_v6 = vpop.f32.mrb[21].mxu1 }
 0x261   : > { %644 = vst [vmem:[%s1437_s18 + $0xa8] sm:$0xff] %v590_v6 }
 0x263   : > { %v594_v7 = vpop.f32.mrb[22].mxu1 }
 0x264   : > { %645 = vst [vmem:[%s1437_s18 + $0xb0] sm:$0xff] %v594_v7  ;;  %v596_v8 = vpop.f32.mrb[23].mxu1 }
 0x265   : > { %646 = vst [vmem:[%s1437_s18 + $0xb8] sm:$0xff] %v596_v8 }
 0x267   : > { %v600_v9 = vpop.f32.mrb[24].mxu1 }
 0x268   : > { %647 = vst [vmem:[%s1437_s18 + $0xc0] sm:$0xff] %v600_v9  ;;  %v602_v10 = vpop.f32.mrb[25].mxu1 }
 0x269   : > { %648 = vst [vmem:[%s1437_s18 + $0xc8] sm:$0xff] %v602_v10 }
 0x26b   : > { %v606_v11 = vpop.f32.mrb[26].mxu1 }
 0x26c   : > { %649 = vst [vmem:[%s1437_s18 + $0xd0] sm:$0xff] %v606_v11  ;;  %v608_v12 = vpop.f32.mrb[27].mxu1 }
 0x26d   : > { %650 = vst [vmem:[%s1437_s18 + $0xd8] sm:$0xff] %v608_v12 }
 0x26f   : > { %v612_v13 = vpop.f32.mrb[28].mxu1 }
 0x270   : > { %651 = vst [vmem:[%s1437_s18 + $0xe0] sm:$0xff] %v612_v13  ;;  %v614_v14 = vpop.f32.mrb[29].mxu1 }
 0x271   : > { %652 = vst [vmem:[%s1437_s18 + $0xe8] sm:$0xff] %v614_v14 }
 0x273   : > { %v618_v15 = vpop.f32.mrb[30].mxu1 }
 0x274   : > { %653 = vst [vmem:[%s1437_s18 + $0xf0] sm:$0xff] %v618_v15  ;;  %v620_v16 = vpop.f32.mrb[31].mxu1 }
 0x275   : > { %654 = vst [vmem:[%s1437_s18 + $0xf8] sm:$0xff] %v620_v16 }
 0x276   : > { %1103 = shalt.err (!%p1100_p2)
}
 0x277   : > { %s1104_s10 = scalar_lea.hbm %s1474_s27, 4096  ;;  %s1108_s26 = scalar_lea.hbm %s1525_s3, 8192 }
 0x278   : > { %p1105_p13 = scmp.ne.s32.totalorder %s1474_s27, %s1104_s10  ;;  %p1109_p4 = scmp.lt.u32.totalorder %s1474_s27, %s1525_s3 }
 0x279   : > { %p1110_p7 = scmp.lt.u32.totalorder %s1108_s26, %s1104_s10  ;;  %p1112_p11 = scmp.lt.u32.totalorder %s1104_s10, %s1474_s27 }
 0x27a   : > { %p1106_p6 = pnand %p1105_p13, %p1539_p0 }
 0x27b   : > { %p1111_p8 = por %p1110_p7, %p1109_p4 }
 0x27c   : > { %p1107_p10 = pneg %p1106_p6 }
 0x27d   : > { %p1113_p1 = por %p1112_p11, %p1111_p8 }
 0x27f   : > { %p1114_p3 = pnand %p1113_p1, %p1107_p10 }
 0x281   : > { %1117 = shalt.err (!%p1114_p3)
}
 0x282   : > { %s1171_s28 = smov 256   ;;  %s1172_s18 = smov 16  }
 0x283   : > { %940 = dma.vmem_to_hbm [thread:$0]  (%p1539_p0), %s1476_s29, 4096, %s1474_s27, %s656_s22, %s1171_s28, %s1171_s28, %s1172_s18  }
 0x284 PF: > { %s685_s20 = sand.u32 1, %s1148_s12   ;;  %p1540_p5 = scmp.ne.s32.totalorder %s1530_s19, 0 }
 0x285   : > { %p1541_p9 = scmp.ge.s32.totalorder %s1160_s15, 2  ;;  %s686_s30 = scalar_lea.sflag [#allocation4], %s685_s20 }
 0x287   : > { %p954_p12 = pnand %p1541_p9, %p1540_p5 }
 0x289   : > { %1143 = dma.done.wait (!%p954_p12), %s686_s30, 4096  }
 0x28a   : > { %1145 = vsyncadd (!%p954_p12), %s686_s30, 4294963200  ;;  %p17_p2 = scmp.ge.s32.totalorder %s1306_s6, 4   ;;  %s1542_s12 = smov %s1152_s13 }
 0x28b   : > { %s1543_s13 = smov %s1156_s14  ;;  %s1544_s14 = smov %s1315_s9 }
 0x28c   : > { %s1545_s15 = smov %s1306_s6  ;;  %19 = sbr.rel (!%p17_p2) target bundleno = 6 (0x6), region = 85 }
 0x293   :  { %691 = vsyncpa [#allocation3], 1 }
 0x294   :  { %693 = vsyncpa [#allocation3 + $0x1], 1 }
 0x295   :  { %694 = vsyncpa [#allocation6], 1 }
 0x296   :  { %695 = vsyncpa [#allocation4], 1 }
 0x297   :  { %697 = vsyncpa [#allocation4 + $0x1], 1 }

</bundles_post_ra>
